<compile_context>
chip_gen: v7x
topology: tpu7x:2x2x1
jax: 0.10.0
libtpu: 0.0.40
codegen_flags: <defaults>
</compile_context>

<pallas_src>
import jax
import jax.numpy as jnp
from jax.experimental import pallas as pl
from jax.experimental.pallas import tpu as pltpu


def _disc_kernel(summary_ref, w0t_ref, h_rl_ref, h_fk_ref, b_ref, out_ref):
    # Ws[n, i] = sum_j summary[n, j] * W0[i, j] == (summary @ W0^T)[n, i].
    # summary / W0^T blocks are grid-invariant over the S axis -> DMA'd once per
    # batch; this tiny (N,F)@(F,F) matmul is negligible next to the h stream.
    ws = jnp.dot(summary_ref[0], w0t_ref[...],
                 preferred_element_type=jnp.float32)            # (N, F) f32

    bias = b_ref[0]                                             # scalar from SMEM

    def score(h_ref):
        h = h_ref[0]                                            # (s_tile, N, F)
        # VPU multiply (promotes to f32) + cross-lane reduce over F, scalar bias add.
        return jnp.sum(h * ws[None, :, :], axis=-1) + bias      # (s_tile, N)

    out_ref[0, 0, :, :] = score(h_rl_ref).astype(out_ref.dtype)
    out_ref[0, 1, :, :] = score(h_fk_ref).astype(out_ref.dtype)


def discriminator_forward(params, summary, h_rl, h_fk, *, s_tile=None, interpret=False):
    """summary: (B, N, F); h_rl, h_fk: (B, S, N, F) -> logits: (B, 2*S, N, 1)."""
    w0, b = params
    B, S, N, F = h_rl.shape
    assert h_fk.shape == h_rl.shape
    assert summary.shape == (B, N, F)
    assert w0.shape == (F, F) and b.shape == (1,)

    w0t = w0.T  # one tiny (F, F) transpose outside the kernel, done once

    # ---- tile selection over the S axis -------------------------------------
    # Budget ~2 MiB of layout-padded VMEM per h tile so that
    #   2 inputs x 2 pipeline buffers x tile + summary + W0^T + output
    # stays well under the 32 MiB scoped-VMEM limit set below (safe on the
    # 64 MiB v7x part as well as v5e/v6e). Large tiles amortize the ~0.35us/step
    # grid overhead.
    n_pad = pl.cdiv(N, 8) * 8
    f_pad = pl.cdiv(F, 128) * 128
    row_bytes = n_pad * f_pad * 4          # conservative (f32) layout-padded row
    if s_tile is None:
        s_tile = max(8, (2 << 20) // row_bytes)
    if s_tile >= S:
        s_tile = S                          # full-dim block is always legal
        s_padded = S
    else:
        s_tile = max(8, (s_tile // 8) * 8)  # 2nd-minor dim of out block: multiple of 8
        s_padded = pl.cdiv(S, s_tile) * s_tile

    if s_padded != S:                       # explicit padding instead of an assert
        pad = [(0, 0), (0, s_padded - S), (0, 0), (0, 0)]
        h_rl = jnp.pad(h_rl, pad)
        h_fk = jnp.pad(h_fk, pad)

    grid = (B, s_padded // s_tile)

    out = pl.pallas_call(
        _disc_kernel,
        out_shape=jax.ShapeDtypeStruct((B, 2, s_padded, N), jnp.float32),
        grid_spec=pltpu.PrefetchScalarGridSpec(
            num_scalar_prefetch=0,
            grid=grid,
            in_specs=[
                pl.BlockSpec((1, N, F), lambda b_, st: (b_, 0, 0)),   # summary (VMEM-resident over S)
                pl.BlockSpec((F, F), lambda b_, st: (0, 0)),          # W0^T (resident)
                pl.BlockSpec((1, s_tile, N, F), lambda b_, st: (b_, st, 0, 0)),  # h_rl tile
                pl.BlockSpec((1, s_tile, N, F), lambda b_, st: (b_, st, 0, 0)),  # h_fk tile
                pl.BlockSpec(memory_space=pltpu.MemorySpace.SMEM),    # bias scalar
            ],
            out_specs=pl.BlockSpec((1, 2, s_tile, N), lambda b_, st: (b_, 0, st, 0)),
        ),
        compiler_params=pltpu.CompilerParams(
            dimension_semantics=("parallel", "parallel"),
            vmem_limit_bytes=32 * 1024 * 1024),
        interpret=interpret,
    )(summary, w0t, h_rl, h_fk, b)

    if s_padded != S:
        out = out[:, :, :S, :]

    # (B, 2, S, N) -> (B, 2*S, N, 1): rows [0:S] real, [S:2S] fake, exactly
    # torch.cat((sc_rl, sc_fk), dim=1); out_features == 1 supplies the trailing 1.
    logits = out.reshape(B, 2 * S, N, 1)
    if N == 1:
        # torch.squeeze(dim=2) removes the size-1 node dim in that case.
        logits = logits.reshape(B, 2 * S, 1)
    return logits


def init_params(key, n_h):
    # nn.Bilinear(n_h, n_h, 1) weight: (1, n_h, n_h); xavier_uniform_:
    # fan_in = n_h * n_h, fan_out = 1 * n_h, bound = sqrt(6 / (fan_in + fan_out))
    fan_in, fan_out = n_h * n_h, 1 * n_h
    bound = (6.0 / (fan_in + fan_out)) ** 0.5
    w = jax.random.uniform(key, (1, n_h, n_h), jnp.float32, -bound, bound)
    b = jnp.zeros((1,), jnp.float32)   # bias.data.fill_(0.0)
    return w[0], b


def reference_forward(params, summary, h_rl, h_fk):
    w0, b = params
    s = jnp.broadcast_to(summary[:, None, :, :], h_rl.shape)
    def bil(h):
        return jnp.einsum("bsni,ij,bsnj->bsn", h, w0, s)[..., None] + b[0]
    return jnp.concatenate((bil(h_rl), bil(h_fk)), axis=1)


if __name__ == "__main__":
    n_h = 32            # feat_dim
    B, S, N = 2, 8, 4   # batch, seq_len, num_nodes

    key = jax.random.PRNGKey(0)
    k_w, k_s, k_r, k_f = jax.random.split(key, 4)
    params = init_params(k_w, n_h)

    summary = jax.random.normal(k_s, (B, N, n_h), jnp.float32)
    h_rl = jax.random.normal(k_r, (B, S, N, n_h), jnp.float32)
    h_fk = jax.random.normal(k_f, (B, S, N, n_h), jnp.float32)

    logits = jax.jit(discriminator_forward)(params, summary, h_rl, h_fk)
    logits = jax.block_until_ready(logits)

    ref = reference_forward(params, summary, h_rl, h_fk)
    assert logits.shape == (B, 2 * S, N, 1), logits.shape
    assert jnp.allclose(logits, ref, atol=1e-5, rtol=1e-5)
    print("KERNEL_OK")
</pallas_src>

<mosaic_0001>
module attributes {stable_mosaic.version = 11 : i64} {
  func.func @_disc_kernel(%arg0: i32, %arg1: i32, %arg2: memref<1x4x32xf32, #tpu.memory_space<vmem>>, %arg3: memref<32x32xf32, #tpu.memory_space<vmem>>, %arg4: memref<1x8x4x32xf32, #tpu.memory_space<vmem>>, %arg5: memref<1x8x4x32xf32, #tpu.memory_space<vmem>>, %arg6: memref<1xf32, #tpu.memory_space<smem>>, %arg7: memref<1x2x8x4xf32, #tpu.memory_space<vmem>>) attributes {dimension_semantics = [#tpu.dimension_semantics<parallel>, #tpu.dimension_semantics<parallel>], iteration_bounds = array<i64: 2, 1>, scalar_prefetch = 0 : i64, scratch_operands = 0 : i64, tpu.core_type = #tpu.core_type<tc>, window_params = [{transform_indices = @transform_0, window_bounds = array<i64: 1, 4, 32>}, {pipeline_mode = #tpu.pipeline_mode<synchronous>, transform_indices = @transform_1, window_bounds = array<i64: 32, 32>}, {transform_indices = @transform_2, window_bounds = array<i64: 1, 8, 4, 32>}, {transform_indices = @transform_3, window_bounds = array<i64: 1, 8, 4, 32>}, {transform_indices = @transform_4, window_bounds = array<i64: 1>}, {transform_indices = @transform_5, window_bounds = array<i64: 1, 2, 8, 4>}]} {
    %c0 = arith.constant 0 : index
    %c0_0 = arith.constant 0 : index
    %c0_1 = arith.constant 0 : index
    %0 = vector.load %arg2[%c0, %c0_0, %c0_1] : memref<1x4x32xf32, #tpu.memory_space<vmem>>, vector<1x4x32xf32>
    %1 = vector.shape_cast %0 : vector<1x4x32xf32> to vector<4x32xf32>
    %c0_2 = arith.constant 0 : index
    %c0_3 = arith.constant 0 : index
    %2 = vector.load %arg3[%c0_2, %c0_3] : memref<32x32xf32, #tpu.memory_space<vmem>>, vector<32x32xf32>
    %cst = arith.constant dense<0.000000e+00> : vector<4x32xf32>
    %3 = tpu.matmul %1, %2, %cst {dimension_numbers = #tpu.dot_dimension_numbers<[1], [0], [0], [1], [0, 0, 1, 1], [], []>} : vector<4x32xf32>, vector<32x32xf32>, vector<4x32xf32> -> vector<4x32xf32>
    %c0_4 = arith.constant 0 : index
    %4 = memref.load %arg6[%c0_4] : memref<1xf32, #tpu.memory_space<smem>>
    %c0_5 = arith.constant 0 : index
    %c0_6 = arith.constant 0 : index
    %c0_7 = arith.constant 0 : index
    %c0_8 = arith.constant 0 : index
    %5 = vector.load %arg4[%c0_5, %c0_6, %c0_7, %c0_8] : memref<1x8x4x32xf32, #tpu.memory_space<vmem>>, vector<1x8x4x32xf32>
    %6 = vector.shape_cast %5 : vector<1x8x4x32xf32> to vector<8x4x32xf32>
    %7 = vector.shape_cast %3 : vector<4x32xf32> to vector<1x4x32xf32>
    %8 = vector.broadcast %7 : vector<1x4x32xf32> to vector<8x4x32xf32>
    %9 = arith.mulf %6, %8 : vector<8x4x32xf32>
    %cst_9 = arith.constant dense<0.000000e+00> : vector<8x4xf32>
    %10 = vector.multi_reduction <add>, %9, %cst_9 [2] : vector<8x4x32xf32> to vector<8x4xf32>
    %11 = vector.broadcast %4 : f32 to vector<8x4xf32>
    %12 = arith.addf %10, %11 : vector<8x4xf32>
    %c0_10 = arith.constant 0 : index
    %c0_11 = arith.constant 0 : index
    %c0_12 = arith.constant 0 : index
    %c0_13 = arith.constant 0 : index
    %13 = vector.load %arg7[%c0_10, %c0_11, %c0_12, %c0_13] : memref<1x2x8x4xf32, #tpu.memory_space<vmem>>, vector<1x1x8x4xf32>
    %14 = vector.shape_cast %13 : vector<1x1x8x4xf32> to vector<8x4xf32>
    %15 = vector.shape_cast %12 : vector<8x4xf32> to vector<1x1x8x4xf32>
    tpu.vector_store %arg7[%c0_10, %c0_11, %c0_12, %c0_13], %15 {strides = array<i32>} : memref<1x2x8x4xf32, #tpu.memory_space<vmem>>, vector<1x1x8x4xf32>,
    %c0_14 = arith.constant 0 : index
    %c0_15 = arith.constant 0 : index
    %c0_16 = arith.constant 0 : index
    %c0_17 = arith.constant 0 : index
    %16 = vector.load %arg5[%c0_14, %c0_15, %c0_16, %c0_17] : memref<1x8x4x32xf32, #tpu.memory_space<vmem>>, vector<1x8x4x32xf32>
    %17 = vector.shape_cast %16 : vector<1x8x4x32xf32> to vector<8x4x32xf32>
    %18 = vector.shape_cast %3 : vector<4x32xf32> to vector<1x4x32xf32>
    %19 = vector.broadcast %18 : vector<1x4x32xf32> to vector<8x4x32xf32>
    %20 = arith.mulf %17, %19 : vector<8x4x32xf32>
    %cst_18 = arith.constant dense<0.000000e+00> : vector<8x4xf32>
    %21 = vector.multi_reduction <add>, %20, %cst_18 [2] : vector<8x4x32xf32> to vector<8x4xf32>
    %22 = vector.broadcast %4 : f32 to vector<8x4xf32>
    %23 = arith.addf %21, %22 : vector<8x4xf32>
    %c0_19 = arith.constant 0 : index
    %c1 = arith.constant 1 : index
    %c0_20 = arith.constant 0 : index
    %c0_21 = arith.constant 0 : index
    %24 = vector.load %arg7[%c0_19, %c1, %c0_20, %c0_21] : memref<1x2x8x4xf32, #tpu.memory_space<vmem>>, vector<1x1x8x4xf32>
    %25 = vector.shape_cast %24 : vector<1x1x8x4xf32> to vector<8x4xf32>
    %26 = vector.shape_cast %23 : vector<8x4xf32> to vector<1x1x8x4xf32>
    tpu.vector_store %arg7[%c0_19, %c1, %c0_20, %c0_21], %26 {strides = array<i32>} : memref<1x2x8x4xf32, #tpu.memory_space<vmem>>, vector<1x1x8x4xf32>,
    return
  }
  func.func @transform_0(%arg0: i32, %arg1: i32) -> (i32, i32, i32) {
    %c0_i32 = arith.constant 0 : i32
    %c0_i32_0 = arith.constant 0 : i32
    %c0_i32_1 = arith.constant 0 : i32
    return %arg0, %c0_i32, %c0_i32_0 : i32, i32, i32
  }
  func.func @transform_1(%arg0: i32, %arg1: i32) -> (i32, i32) {
    %c0_i32 = arith.constant 0 : i32
    %c0_i32_0 = arith.constant 0 : i32
    %c0_i32_1 = arith.constant 0 : i32
    return %c0_i32, %c0_i32_0 : i32, i32
  }
  func.func @transform_2(%arg0: i32, %arg1: i32) -> (i32, i32, i32, i32) {
    %c0_i32 = arith.constant 0 : i32
    %c0_i32_0 = arith.constant 0 : i32
    %c0_i32_1 = arith.constant 0 : i32
    return %arg0, %arg1, %c0_i32, %c0_i32_0 : i32, i32, i32, i32
  }
  func.func @transform_3(%arg0: i32, %arg1: i32) -> (i32, i32, i32, i32) {
    %c0_i32 = arith.constant 0 : i32
    %c0_i32_0 = arith.constant 0 : i32
    %c0_i32_1 = arith.constant 0 : i32
    return %arg0, %arg1, %c0_i32, %c0_i32_0 : i32, i32, i32, i32
  }
  func.func @transform_4(%arg0: i32, %arg1: i32) -> i32 {
    %c0_i32 = arith.constant 0 : i32
    %c0_i32_0 = arith.constant 0 : i32
    return %c0_i32 : i32
  }
  func.func @transform_5(%arg0: i32, %arg1: i32) -> (i32, i32, i32, i32) {
    %c0_i32 = arith.constant 0 : i32
    %c0_i32_0 = arith.constant 0 : i32
    %c0_i32_1 = arith.constant 0 : i32
    return %arg0, %c0_i32, %arg1, %c0_i32_0 : i32, i32, i32, i32
  }
}

</mosaic_0001>

<bundles_post_ra>
// kernel: discriminator_forward.1
= control target key start
LH: loop header
LB: loop body
LE: loop exit
PB: predicated region body
PF: predicated region fallthrough
CT: control target
= control target key end

     0   :  { %s1160_s0 = inlined_call_operand.vmem [shape: f32[2,4,32], index: 0, kind: input, shape index: {}]   ;;  %s1161_s1 = inlined_call_operand.vmem [shape: f32[32,32], index: 1, kind: input, shape index: {}]   ;;  %s1162_s2 = inlined_call_operand.vmem [shape: f32[2,8,4,32], index: 2, kind: input, shape index: {}]   ;;  %s1163_s3 = inlined_call_operand.hbm [shape: f32[2,8,4,32], index: 3, kind: input, shape index: {}]   ;;  %s1164_s4 = inlined_call_operand.<no memory space> [shape: f32[1], index: 4, kind: input, shape index: {}]   ;;  %s1165_s5 = inlined_call_operand.vmem [shape: f32[2,2,8,4], index: 5, kind: output, shape index: {}]  }
   0x1   :  { %10 = sst [smem:[#allocation2]] %s1164_s4 }
   0x2   :  { %11 = vsyncpa [#allocation4], 0 }
   0x3   :  { %13 = vsyncpa [#allocation4 + $0x1], 0  ;;  %s957_s20 = smov 0   ;;  %s959_s21 = smov 0  }
   0x4   :  { %s961_s22 = smov 0   ;;  %s963_s23 = smov 0  }
   0x5   :  { %s965_s24 = smov 0   ;;  %s967_s25 = smov 0  }
   0x6 LB: > { %s733_s4 = sadd.s32 4294967295, %s916_s25   ;;  %s31_s26 = sadd.s32 1, %s912_s24  ;;  %s916_s25 = sphi %s967_s25, %s19_s25   ;;  %s912_s24 = sphi %s965_s24, %s1173_s24   ;;  %s908_s23 = sphi %s963_s23, %s1172_s23   ;;  %s904_s22 = sphi %s961_s22, %s1171_s22   ;;  %s900_s21 = sphi %s959_s21, %s1170_s21   ;;  %s896_s20 = sphi %s957_s20, %s1169_s20  }
   0x7   : > { %p33_p0 = scmp.ge.s32.totalorder %s31_s26, 2  ;;  %s115_s27 = sadd.s32 1, %s904_s22 }
   0x8   : > { %p122_p1 = scmp.ne.s32.totalorder %s904_s22, %s900_s21  ;;  %p123_p2 = scmp.eq.s32.totalorder %s916_s25, 0 }
   0x9   : > { %s1175_s26 = smov (%p33_p0, %s31_s26), 0  ;;  %p128_p4 = scmp.ne.s32.totalorder %s900_s21, %s896_s20 }
   0xa   : > { %p993_p3 = por %p123_p2, %p122_p1  ;;  %s110_s29 = ssub.s32 %s912_s24, %s1175_s26 }
   0xb   : > { %p129_p5 = scmp.eq.s32.totalorder %s733_s4, 0  ;;  %p113_p6 = scmp.eq.s32.totalorder %s110_s29, 0 }
   0xc   : > { %p782_p8 = scmp.lt.s32.totalorder %s916_s25, 2  ;;  %s227_s7 = sand.u32 1, %s904_s22  }
   0xd   : > { %p1000_p7 = por %p129_p5, %p128_p4  ;;  %s751_s8 = sshll.u32 %s912_s24, 9 }
   0xe   : > { %s1006_s6 = scalar_select %p113_p6, %s904_s22, %s115_s27  }
   0xf   : > { %s737_s9 = sshll.u32 %s227_s7, 5  ;;  %s1013_s12 = scalar_lea.hbm %s1163_s3, %s751_s8 }
  0x10   : > { %s231_s13 = scalar_lea.vmem [#allocation3], %s737_s9  ;;  %p1017_p9 = pnand %p782_p8, %p993_p3 }
  0x11   : > { %s240_s14 = sshll.u32 %s231_s13, 4  ;;  %s1023_s16 = scalar_lea.sflag [#allocation4], %s227_s7  ;;  %s1021_s14 = int_to_ptr.vmem [resolvable:$true] %s240_s14 }
  0x12   : > { %s836_s17 = scalar_lea.hbm %s1013_s12, 512  ;;  %p838_p11 = pneg %p1017_p9 }
  0x13   : > { %p837_p10 = scmp.ne.s32.totalorder %s1013_s12, %s836_s17  ;;  %s841_s20 = scalar_lea.hbm %s1163_s3, 1024 }
  0x14   : > { %p842_p0 = scmp.lt.u32.totalorder %s1013_s12, %s1163_s3  ;;  %p843_p1 = scmp.lt.u32.totalorder %s841_s20, %s836_s17 }
  0x15   : > { %p839_p12 = pnand %p838_p11, %p837_p10  ;;  %p845_p3 = scmp.lt.u32.totalorder %s836_s17, %s1013_s12 }
  0x16   : > { %p844_p2 = por %p843_p1, %p842_p0 }
  0x17   : > { %p840_p13 = pneg %p839_p12 }
  0x18   : > { %p846_p4 = por %p845_p3, %p844_p2 }
  0x1a   : > { %p847_p5 = pnand %p846_p4, %p840_p13 }
  0x1c   : > { %850 = shalt.err (!%p847_p5)
}
  0x1d   : > { %s851_s28 = scalar_lea.vmem %s1021_s14, 512  ;;  %s918_s29 = smov [#allocation3]  }
  0x1e   : > { %p852_p6 = scmp.ne.s32.totalorder %s1021_s14, %s851_s28  ;;  %s856_s7 = sshll.u32 %s918_s29, 4  ;;  %s857_s7 = int_to_ptr.vmem [resolvable:$false] %s856_s7 }
  0x1f   : > { %s858_s8 = scalar_lea.vmem %s857_s7, 1024  ;;  %p859_p12 = scmp.lt.s32.totalorder %s1021_s14, %s857_s7 }
  0x20   : > { %p854_p8 = pnand %p852_p6, %p838_p11  ;;  %p860_p0 = scmp.lt.s32.totalorder %s858_s8, %s851_s28 }
  0x22   : > { %p855_p10 = pneg %p854_p8  ;;  %p861_p1 = por %p860_p0, %p859_p12 }
  0x24   : > { %p862_p2 = pnand %p861_p1, %p855_p10 }
  0x26   : > { %865 = shalt.err (!%p862_p2)
}
  0x27   : > { %s919_s9 = smov 64   ;;  %s920_s10 = smov 4  }
  0x28   : > { %781 = dma.hbm_to_vmem [thread:$0]  (!%p1017_p9), %s1013_s12, 512, %s1021_s14, %s1023_s16, %s919_s9, %s919_s9, %s920_s10  }
  0x29   : > { %p740_p11 = scmp.ge.s32.totalorder %s916_s25, 1  ;;  %p248_p13 = scmp.lt.s32.totalorder %s916_s25, 3 }
  0x2b   : > { %p249_p3 = pnand %p740_p11, %p248_p13 }
  0x2c   : > { %s254_s11 = sand.u32 (!%p249_p3), 1, %s900_s21  }
  0x2d   : > { %252 = sbr.rel (%p249_p3) target bundleno = 455 (0x1c7), region = 40  ;;  %s741_s13 = sshll.u32 (!%p249_p3), %s254_s11, 5 }
  0x2e   : > { %s255_s17 = scalar_lea.sflag (!%p249_p3), [#allocation4], %s254_s11  ;;  %s1054_s18 = scalar_lea.vmem (!%p249_p3), [#allocation3], %s741_s13 }
  0x34   : > { %891 = dma.done.wait (%p1000_p7), %s255_s17, 512  }
  0x35   : > { %893 = vsyncadd (%p1000_p7), %s255_s17, 4294966784  ;;  %p301_p4 = scmp.lt.s32.totalorder %s908_s23, 1  ;;  %v921_v0 = vmov 0.0|0.0   ;;  %vm922_vm0 = vmmov 0   ;;  %v923_v1 = vmov 0.0   ;;  %v325_v2 = vld [vmem:[%s1161_s1] sm:$0xff] }
  0x36   : > { %770 = vmatprep.subr.bf16.mxu0 %v921_v0  ;;  %767 = vmatprep.mubr.msk.f32.mxu0 %vm922_vm0, %v923_v1  ;;  %v326_v3 = vld [vmem:[%s1161_s1 + $0x8] sm:$0xff]  ;;  %v327_v4 = vld [vmem:[%s1161_s1 + $0x10] sm:$0xff]  ;;  %v328_v6 = vld [vmem:[%s1161_s1 + $0x18] sm:$0xff]  ;;  %vm329_vm1 = vcmask 261120   ;;  %vm420_vm2 = vcmask 257024   ;;  %s403_s13 = sld [smem:[#allocation2]]  ;;  %v462_v1 = vlaneseq }
  0x37   : > { %s1177_s23 = smov (!%p301_p4, %s908_s23), 1  ;;  %v771_v5 = vpack.c.bf16 %v326_v3, %v325_v2  ;;  %v774_v7 = vpack.c.bf16 %v328_v6, %v327_v4  ;;  %v513_v9 = vld [vmem:[%s1054_s18] sm:$0xf]  ;;  %v514_v15 = vld [vmem:[%s1054_s18 + $0x4] sm:$0xf]  ;;  %vm496_vm3 = vcmask 1041409  }
  0x38   : > { %s742_s27 = sshll.u32 %s1177_s23, 2  ;;  %s752_s8 = sshll.u32 %s1177_s23, 5  ;;  %v515_v29 = vld [vmem:[%s1054_s18 + $0x8] sm:$0xf]  ;;  %v516_v37 = vld [vmem:[%s1054_s18 + $0xc] sm:$0xf] }
  0x39   : > { %772 = vmatpush3.bf16.msra.mxu0 %v771_v5  ;;  %s304_s7 = scalar_lea.vmem %s1160_s0, %s742_s27  ;;  %s313_s11 = scalar_lea.vmem %s1162_s2, %s752_s8  ;;  %v517_v41 = vld [vmem:[%s1054_s18 + $0x10] sm:$0xf]  ;;  %v518_v45 = vld [vmem:[%s1054_s18 + $0x14] sm:$0xf]  ;;  %v519_v49 = vld [vmem:[%s1054_s18 + $0x18] sm:$0xf] }
  0x3a   : > { %773 = vmatprep.subr.bf16.mxu0 %v921_v0  ;;  %v324_v8 = vld [vmem:[%s304_s7] sm:$0xf]  ;;  %v405_v11 = vld [vmem:[%s313_s11 + $0x4] sm:$0xf]  ;;  %v406_v12 = vld [vmem:[%s313_s11 + $0x8] sm:$0xf] }
  0x3b   : > { %v404_v10 = vld [vmem:[%s313_s11] sm:$0xf]  ;;  %v407_v13 = vld [vmem:[%s313_s11 + $0xc] sm:$0xf]  ;;  %v408_v22 = vld [vmem:[%s313_s11 + $0x10] sm:$0xf] }
  0x3c   : > { %v409_v23 = vld [vmem:[%s313_s11 + $0x14] sm:$0xf]  ;;  %v410_v27 = vld [vmem:[%s313_s11 + $0x18] sm:$0xf]  ;;  %v411_v28 = vld [vmem:[%s313_s11 + $0x1c] sm:$0xf] }
  0x3d   : > { %775 = vmatpush3.bf16.msra.mxu0 %v774_v7  ;;  %v520_v53 = vld [vmem:[%s1054_s18 + $0x1c] sm:$0xf]  ;;  %v463_v4 = vand.u32 127, %v462_v1  ;;  %v465_v5 = vshrl.u32 %v462_v1, 7  ;;  %vm498_vm4 = vcmask 1042434   ;;  %vm500_vm5 = vcmask 1043459  }
  0x3e   : > { %vm502_vm6 = vcmask 1044484   ;;  %vm504_vm7 = vcmask 1045509   ;;  %vm506_vm8 = vcmask 1046534   ;;  %s753_s17 = sshll.u32 %s1177_s23, 4  ;;  %vm508_vm9 = vcmask 1047559  }
  0x3f   : > { %vm511_vm10 = vcmask 31744   ;;  %s323_s12 = scalar_lea.vmem %s1165_s5, %s753_s17 }
  0x40   : > { %768 = vmatmul.mubr.msk.f32.vlgmr.msra.gmra.mrb[0].mxu0 %vm329_vm1, %v324_v8  ;;  %v445_v8 = vstv %s403_s13 }
 0x113   : > { %v399_v14 = vpop.f32.mrb[0].mxu0 }
 0x114   : > { %v769_v16 = vpop.f32.mrb[1].mxu0  ;;  %v521_v17 = vmul.f32 %v513_v9, %v399_v14  ;;  %v412_v18 = vmul.f32 %v404_v10, %v399_v14  ;;  %v413_v19 = vmul.f32 %v405_v11, %v399_v14  ;;  %v414_v20 = vmul.f32 %v406_v12, %v399_v14 }
 0x115   : > { %v415_v21 = vmul.f32 %v407_v13, %v399_v14  ;;  %v522_v26 = vmul.f32 %v514_v15, %v399_v14  ;;  %v416_v30 = vmul.f32 %v408_v22, %v399_v14  ;;  %v417_v31 = vmul.f32 %v409_v23, %v399_v14 }
 0x116   : > { %v529_v24 = vsel %vm420_vm2, %v521_v17, 0.0  ;;  %v421_v25 = vsel %vm420_vm2, %v412_v18, 0.0  ;;  %v418_v32 = vmul.f32 %v410_v27, %v399_v14  ;;  %v419_v33 = vmul.f32 %v411_v28, %v399_v14 }
 0x117   : > { %530 = vadd.xlane.f32.xlu1 %v529_v24  ;;  %422 = vadd.xlane.f32.xlu0 %v421_v25  ;;  %v532_v34 = vsel %vm420_vm2, %v522_v26, 0.0  ;;  %v424_v35 = vsel %vm420_vm2, %v413_v19, 0.0  ;;  %v523_v36 = vmul.f32 %v515_v29, %v399_v14  ;;  %v427_v39 = vsel %vm420_vm2, %v414_v20, 0.0 }
 0x118   : > { %v524_v40 = vmul.f32 %v516_v37, %v399_v14  ;;  %v430_v43 = vsel %vm420_vm2, %v415_v21, 0.0  ;;  %v525_v44 = vmul.f32 %v517_v41, %v399_v14  ;;  %v433_v47 = vsel %vm420_vm2, %v416_v30, 0.0 }
 0x119   : > { %v535_v38 = vsel %vm420_vm2, %v523_v36, 0.0  ;;  %v526_v48 = vmul.f32 %v518_v45, %v399_v14  ;;  %v436_v51 = vsel %vm420_vm2, %v417_v31, 0.0  ;;  %v527_v52 = vmul.f32 %v519_v49, %v399_v14 }
 0x11a   : > { %v538_v42 = vsel %vm420_vm2, %v524_v40, 0.0  ;;  %v541_v46 = vsel %vm420_vm2, %v525_v44, 0.0  ;;  %v439_v55 = vsel %vm420_vm2, %v418_v32, 0.0  ;;  %v528_v56 = vmul.f32 %v520_v53, %v399_v14 }
 0x11b   : > { %533 = vadd.xlane.f32.xlu1 %v532_v34  ;;  %425 = vadd.xlane.f32.xlu0 %v424_v35  ;;  %v544_v50 = vsel %vm420_vm2, %v526_v48, 0.0  ;;  %v547_v54 = vsel %vm420_vm2, %v527_v52, 0.0  ;;  %v442_v58 = vsel %vm420_vm2, %v419_v33, 0.0  ;;  %v1108_v9 = vsub.s32 %v463_v4, %v465_v5 }
 0x11c   : > { %v550_v57 = vsel %vm420_vm2, %v528_v56, 0.0 }
 0x11f   : > { %536 = vadd.xlane.f32.xlu1 %v535_v38  ;;  %428 = vadd.xlane.f32.xlu0 %v427_v39 }
 0x123   : > { %539 = vadd.xlane.f32.xlu1 %v538_v42  ;;  %431 = vadd.xlane.f32.xlu0 %v430_v43 }
 0x127   : > { %542 = vadd.xlane.f32.xlu1 %v541_v46  ;;  %434 = vadd.xlane.f32.xlu0 %v433_v47 }
 0x12b   : > { %545 = vadd.xlane.f32.xlu1 %v544_v50  ;;  %437 = vadd.xlane.f32.xlu0 %v436_v51 }
 0x12f   : > { %548 = vadd.xlane.f32.xlu1 %v547_v54  ;;  %440 = vadd.xlane.f32.xlu0 %v439_v55 }
 0x133   : > { %551 = vadd.xlane.f32.xlu1 %v550_v57  ;;  %443 = vadd.xlane.f32.xlu0 %v442_v58 }
 0x1a4   : > { %v531_v59 = vpop.xlane.xlu1 %530  ;;  %v423_v60 = vpop.xlane.xlu0 %422 }
 0x1a5   : > { %v553_v12 = vadd.f32 %v531_v59, %v445_v8  ;;  %v446_v13 = vadd.f32 %v445_v8, %v423_v60 }
 0x1a7   : > { %v572_v26 = vrot.slane %v553_v12, %v1108_v9  ;;  %v467_v27 = vrot.slane %v446_v13, %v1108_v9 }
 0x1a8   : > { %v534_v61 = vpop.xlane.xlu1 %533  ;;  %v426_v62 = vpop.xlane.xlu0 %425 }
 0x1a9   : > { %v554_v10 = vadd.f32 %v534_v61, %v445_v8  ;;  %v447_v11 = vadd.f32 %v445_v8, %v426_v62 }
 0x1ab   : > { %v576_v22 = vrot.slane %v554_v10, %v1108_v9  ;;  %v471_v23 = vrot.slane %v447_v11, %v1108_v9 }
 0x1ac   : > { %v537_v63 = vpop.xlane.xlu1 %536  ;;  %v429_v0 = vpop.xlane.xlu0 %428 }
 0x1ad   : > { %v555_v14 = vadd.f32 %v537_v63, %v445_v8  ;;  %v448_v15 = vadd.f32 %v445_v8, %v429_v0  ;;  %v601_v38 = vsel %vm496_vm3, %v576_v22, %v572_v26  ;;  %v497_v39 = vsel %vm496_vm3, %v471_v23, %v467_v27 }
 0x1af   : > { %v580_v28 = vrot.slane %v555_v14, %v1108_v9  ;;  %v475_v29 = vrot.slane %v448_v15, %v1108_v9 }
 0x1b0   : > { %v540_v2 = vpop.xlane.xlu1 %539  ;;  %v432_v3 = vpop.xlane.xlu0 %431 }
 0x1b1   : > { %v556_v18 = vadd.f32 %v540_v2, %v445_v8  ;;  %v449_v19 = vadd.f32 %v445_v8, %v432_v3  ;;  %v602_v42 = vsel %vm498_vm4, %v580_v28, %v601_v38  ;;  %v499_v43 = vsel %vm498_vm4, %v475_v29, %v497_v39 }
 0x1b3   : > { %v584_v32 = vrot.slane %v556_v18, %v1108_v9  ;;  %v479_v33 = vrot.slane %v449_v19, %v1108_v9 }
 0x1b4   : > { %v543_v6 = vpop.xlane.xlu1 %542  ;;  %v435_v7 = vpop.xlane.xlu0 %434 }
 0x1b5   : > { %v557_v20 = vadd.f32 %v543_v6, %v445_v8  ;;  %v450_v21 = vadd.f32 %v445_v8, %v435_v7  ;;  %v603_v48 = vsel %vm500_vm5, %v584_v32, %v602_v42  ;;  %v501_v49 = vsel %vm500_vm5, %v479_v33, %v499_v43 }
 0x1b7   : > { %v588_v36 = vrot.slane %v557_v20, %v1108_v9  ;;  %v483_v37 = vrot.slane %v450_v21, %v1108_v9 }
 0x1b8   : > { %v546_v16 = vpop.xlane.xlu1 %545  ;;  %v438_v17 = vpop.xlane.xlu0 %437 }
 0x1b9   : > { %v558_v24 = vadd.f32 %v546_v16, %v445_v8  ;;  %v451_v25 = vadd.f32 %v445_v8, %v438_v17  ;;  %v604_v52 = vsel %vm502_vm6, %v588_v36, %v603_v48  ;;  %v503_v53 = vsel %vm502_vm6, %v483_v37, %v501_v49 }
 0x1bb   : > { %v592_v40 = vrot.slane %v558_v24, %v1108_v9  ;;  %v487_v41 = vrot.slane %v451_v25, %v1108_v9 }
 0x1bc   : > { %v549_v30 = vpop.xlane.xlu1 %548  ;;  %v441_v31 = vpop.xlane.xlu0 %440 }
 0x1bd   : > { %v559_v34 = vadd.f32 %v549_v30, %v445_v8  ;;  %v452_v35 = vadd.f32 %v445_v8, %v441_v31  ;;  %v605_v54 = vsel %vm504_vm7, %v592_v40, %v604_v52  ;;  %v505_v55 = vsel %vm504_vm7, %v487_v41, %v503_v53 }
 0x1bf   : > { %v596_v44 = vrot.slane %v559_v34, %v1108_v9  ;;  %v491_v45 = vrot.slane %v452_v35, %v1108_v9 }
 0x1c0   : > { %v552_v46 = vpop.xlane.xlu1 %551  ;;  %v444_v47 = vpop.xlane.xlu0 %443 }
 0x1c1   : > { %v560_v50 = vadd.f32 %v552_v46, %v445_v8  ;;  %v453_v51 = vadd.f32 %v445_v8, %v444_v47  ;;  %v606_v58 = vsel %vm506_vm8, %v596_v44, %v605_v54  ;;  %v507_v59 = vsel %vm506_vm8, %v491_v45, %v505_v55 }
 0x1c3   : > { %v600_v56 = vrot.slane %v560_v50, %v1108_v9  ;;  %v495_v57 = vrot.slane %v453_v51, %v1108_v9 }
 0x1c5   : > { %v607_v60 = vsel %vm508_vm9, %v600_v56, %v606_v58  ;;  %v509_v61 = vsel %vm508_vm9, %v495_v57, %v507_v59 }
 0x1c6   : > { %748 = vst.msk [vmem:[%s323_s12 + $0x8] sm:$0xff] %vm511_vm10, %v607_v60  ;;  %512 = vst.msk [vmem:[%s323_s12] sm:$0xff] %vm511_vm10, %v509_v61 }
 0x1c7 PF: > { %s19_s25 = sadd.s32 1, %s916_s25   ;;  %s1169_s20 = smov %s900_s21 }
 0x1c8   : > { %p16_p7 = scmp.ge.s32.totalorder %s19_s25, 4   ;;  %s1170_s21 = smov %s904_s22 }
 0x1c9   : > { %s1171_s22 = smov %s1006_s6  ;;  %s1172_s23 = smov %s912_s24 }
 0x1ca   : > { %s1173_s24 = smov %s1175_s26  ;;  %18 = sbr.rel (!%p16_p7) target bundleno = 6 (0x6), region = 87 }
 0x1d1   :  { %638 = vsyncpa [#allocation4], 1 }
 0x1d2   :  { %640 = vsyncpa [#allocation4 + $0x1], 1 }

</bundles_post_ra>
